<compile_context>
chip_gen: v6e
topology: v6e:2x2x1
jax: 0.10.0
libtpu: 0.0.40
codegen_flags: <defaults>
</compile_context>

<pallas_src>
import math

import jax
import jax.numpy as jnp
from jax.experimental import pallas as pl
from jax.experimental.pallas import tpu as pltpu

_LANE = 128
_TARGET_BLOCK_BYTES = 2 * 1024 * 1024  # ~2 MiB x-blocks (mem-bound sweet spot: 1-4 MiB)


def _layer_scale_kernel(x_ref, g_ref, o_ref):
    # Pure VPU elementwise multiply; both operands are full (tile_rows, lane_w) tiles,
    # so there is no per-step sublane broadcast of a 1-row gamma operand.
    o_ref[...] = x_ref[...] * g_ref[...]


def layer_scale(x: jax.Array, gamma: jax.Array, *, donate_x: bool = False) -> jax.Array:
    """y = x * gamma with gamma of shape (dim,) broadcast over the leading axes of x.

    Matches PyTorch `x * self.gamma`, including dtype promotion
    (e.g. bf16 activations * f32 gamma -> f32 output).
    """
    orig_shape = x.shape
    dim = orig_shape[-1]
    assert gamma.shape == (dim,), f"gamma must be ({dim},), got {gamma.shape}"

    # PyTorch-style type promotion (do NOT silently downcast gamma to x.dtype).
    out_dtype = jnp.result_type(x.dtype, gamma.dtype)
    xc = x.astype(out_dtype)
    gc = gamma.astype(out_dtype)
    itemsize = jnp.dtype(out_dtype).itemsize
    sub = max(8, 32 // itemsize)  # sublane multiple: 8 (f32/i32), 16 (bf16), 32 (i8)

    rows = 1
    for s in orig_shape[:-1]:
        rows *= s
    rows = max(rows, 1)

    # Lane densification: fold k consecutive rows into the lane axis so the last
    # (lane) dimension is a multiple of 128 -> unmasked full-width vector stores.
    # Only done when it divides evenly (a pure reshape, no data copy / padding).
    k = _LANE // math.gcd(dim, _LANE)
    if k > 1 and rows % k == 0:
        lane_w = k * dim
        n_rows = rows // k
        g_row = jnp.tile(gc, k)  # gamma repeated k times matches the folded column order
    else:
        k = 1
        lane_w = dim
        n_rows = rows
        g_row = gc

    x2d = xc.reshape(n_rows, lane_w)

    # Row tile sized by bytes (~_TARGET_BLOCK_BYTES), rounded to the sublane multiple;
    # ragged last block handled by a cdiv grid (keeps pipelining + megacore sharding).
    if n_rows >= sub:
        by_bytes = _TARGET_BLOCK_BYTES // (lane_w * itemsize)
        by_bytes = max(sub, (by_bytes // sub) * sub)
        max_tile = (n_rows // sub) * sub
        tile_rows = min(by_bytes, max_tile)
    else:
        tile_rows = n_rows  # full-extent block (allowed even when < 8 sublanes)

    grid = (pl.cdiv(n_rows, tile_rows),)
    block_bytes = tile_rows * lane_w * itemsize

    # Pre-broadcast gamma to one full (tile_rows, lane_w) tile in the wrapper:
    # constant index_map -> stays resident in VMEM across the whole grid.
    g_block = jnp.broadcast_to(g_row[None, :], (tile_rows, lane_w))

    out2d = pl.pallas_call(
        _layer_scale_kernel,
        out_shape=jax.ShapeDtypeStruct((n_rows, lane_w), out_dtype),
        grid_spec=pltpu.PrefetchScalarGridSpec(
            num_scalar_prefetch=0,
            grid=grid,
            in_specs=[
                pl.BlockSpec((tile_rows, lane_w), lambda i: (i, 0)),
                pl.BlockSpec((tile_rows, lane_w), lambda i: (0, 0)),  # gamma, resident
            ],
            out_specs=pl.BlockSpec((tile_rows, lane_w), lambda i: (i, 0)),
        ),
        compiler_params=pltpu.CompilerParams(
            # Row axis is embarrassingly parallel -> shards across TensorCores on v7x.
            dimension_semantics=("parallel",),
            # Explicit scoped-VMEM budget (covers double-buffered in/out + gamma),
            # above v5e's 16 MiB default, comfortably within v7x's 64 MiB physical VMEM.
            vmem_limit_bytes=int(min(64 * 2**20, max(32 * 2**20, 8 * block_bytes))),
        ),
        # Optional in-place-style path (PyTorch inplace=True / donated x): alias x -> out.
        input_output_aliases=({0: 0} if donate_x else {}),
    )(x2d, g_block)

    return out2d.reshape(orig_shape)


if __name__ == "__main__":
    # Module config (deterministic init, matching nn.Parameter(init_values * torch.ones(dim))).
    dim = 32
    init_values = 1e-05
    gamma = init_values * jnp.ones((dim,), dtype=jnp.float32)

    # Example input: (batch=2, seq=8, hidden=32).
    key = jax.random.PRNGKey(0)
    x = jax.random.normal(key, (2, 8, dim), dtype=jnp.float32)

    y = layer_scale(x, gamma)
    jax.block_until_ready(y)
    assert y.shape == x.shape and y.dtype == jnp.float32
    assert jnp.allclose(y, x * gamma, atol=1e-7, rtol=1e-6), "mismatch vs reference (f32)"

    # Fallback path: dim not a multiple of 128 and rows not foldable (ragged cdiv grid).
    x2 = jax.random.normal(jax.random.PRNGKey(1), (3, 5, 50), dtype=jnp.float32)
    g2 = init_values * jnp.ones((50,), dtype=jnp.float32)
    y2 = layer_scale(x2, g2)
    jax.block_until_ready(y2)
    assert jnp.allclose(y2, x2 * g2, atol=1e-7, rtol=1e-6), "mismatch vs reference (ragged)"

    # Dtype promotion: bf16 activations * f32 gamma -> f32 output (matches PyTorch).
    xb = x.astype(jnp.bfloat16)
    yb = layer_scale(xb, gamma)
    jax.block_until_ready(yb)
    assert yb.dtype == jnp.float32
    assert jnp.allclose(yb, xb.astype(jnp.float32) * gamma, atol=1e-6, rtol=1e-5), \
        "mismatch vs reference (bf16 promotion)"

    print("KERNEL_OK")
</pallas_src>

<mosaic_0001>
module attributes {stable_mosaic.version = 11 : i64} {
  func.func @_layer_scale_kernel(%arg0: i32, %arg1: memref<4x128xf32, #tpu.memory_space<vmem>>, %arg2: memref<4x128xf32, #tpu.memory_space<vmem>>, %arg3: memref<4x128xf32, #tpu.memory_space<vmem>>) attributes {dimension_semantics = [#tpu.dimension_semantics<parallel>], iteration_bounds = array<i64: 1>, scalar_prefetch = 0 : i64, scratch_operands = 0 : i64, tpu.core_type = #tpu.core_type<tc>, window_params = [{transform_indices = @transform_0, window_bounds = array<i64: 4, 128>}, {pipeline_mode = #tpu.pipeline_mode<synchronous>, transform_indices = @transform_1, window_bounds = array<i64: 4, 128>}, {transform_indices = @transform_2, window_bounds = array<i64: 4, 128>}]} {
    %c0 = arith.constant 0 : index
    %c0_0 = arith.constant 0 : index
    %0 = vector.load %arg1[%c0, %c0_0] : memref<4x128xf32, #tpu.memory_space<vmem>>, vector<4x128xf32>
    %c0_1 = arith.constant 0 : index
    %c0_2 = arith.constant 0 : index
    %1 = vector.load %arg2[%c0_1, %c0_2] : memref<4x128xf32, #tpu.memory_space<vmem>>, vector<4x128xf32>
    %2 = arith.mulf %0, %1 : vector<4x128xf32>
    %c0_3 = arith.constant 0 : index
    %c0_4 = arith.constant 0 : index
    %3 = vector.load %arg3[%c0_3, %c0_4] : memref<4x128xf32, #tpu.memory_space<vmem>>, vector<4x128xf32>
    tpu.vector_store %arg3[%c0_3, %c0_4], %2 {strides = array<i32>} : memref<4x128xf32, #tpu.memory_space<vmem>>, vector<4x128xf32>,
    return
  }
  func.func @transform_0(%arg0: i32) -> (i32, i32) {
    %c0_i32 = arith.constant 0 : i32
    %c0_i32_0 = arith.constant 0 : i32
    return %arg0, %c0_i32 : i32, i32
  }
  func.func @transform_1(%arg0: i32) -> (i32, i32) {
    %c0_i32 = arith.constant 0 : i32
    %c0_i32_0 = arith.constant 0 : i32
    %c0_i32_1 = arith.constant 0 : i32
    return %c0_i32, %c0_i32_0 : i32, i32
  }
  func.func @transform_2(%arg0: i32) -> (i32, i32) {
    %c0_i32 = arith.constant 0 : i32
    %c0_i32_0 = arith.constant 0 : i32
    return %arg0, %c0_i32 : i32, i32
  }
}

</mosaic_0001>

<bundles_post_ra>
// kernel: tpu_custom_call.1
= control target key start
LH: loop header
LB: loop body
LE: loop exit
PB: predicated region body
PF: predicated region fallthrough
CT: control target
= control target key end

     0   :  { %7 = vsyncpa [#allocation3], 0  ;;  %s152_s0 = inlined_call_operand.hbm [shape: f32[4,128], index: 0, kind: input, shape index: {}]   ;;  %s153_s1 = inlined_call_operand.hbm [shape: f32[4,128], index: 1, kind: input, shape index: {}]   ;;  %s154_s2 = inlined_call_operand.hbm [shape: f32[4,128], index: 2, kind: output, shape index: {}]  }
   0x1   :  { %8 = vsyncpa [#allocation6], 0 }
   0x2   :  { %9 = vsyncpa [#allocation4], 0  ;;  %s125_s9 = smov [#allocation2]   ;;  %s126_s11 = smov [#allocation5]  }
   0x3   :  { %s16_s10 = sshll.u32 %s125_s9, 4  ;;  %s26_s12 = sshll.u32 %s126_s11, 4  ;;  %s17_s10 = int_to_ptr.vmem [resolvable:$true] %s16_s10  ;;  %s27_s12 = int_to_ptr.vmem [resolvable:$true] %s26_s12 }
   0x4   :  { %s67_s13 = scalar_lea.vmem %s17_s10, 64  ;;  %p72_p1 = scmp.lt.s32.totalorder %s17_s10, %s17_s10 }
   0x5   :  { %p68_p0 = scmp.ne.s32.totalorder %s17_s10, %s67_s13  ;;  %p73_p2 = scmp.lt.s32.totalorder %s67_s13, %s67_s13 }
   0x7   :  { %p74_p3 = por %p73_p2, %p72_p1 }
   0x9   :  { %p75_p4 = pnand %p74_p3, %p68_p0 }
   0xb   :  { %78 = shalt.err (!%p75_p4)
}
   0xc   :  { %19 = dma.hbm_to_vmem [thread:$0]  %s152_s0, 64, %s17_s10, [#allocation3]  }
   0xd   :  { %s87_s16 = scalar_lea.vmem %s27_s12, 64  ;;  %p92_p6 = scmp.lt.s32.totalorder %s27_s12, %s27_s12 }
   0xe   :  { %p88_p5 = scmp.ne.s32.totalorder %s27_s12, %s87_s16  ;;  %p93_p7 = scmp.lt.s32.totalorder %s87_s16, %s87_s16 }
  0x10   :  { %p94_p8 = por %p93_p7, %p92_p6 }
  0x12   :  { %p95_p9 = pnand %p94_p8, %p88_p5 }
  0x14   :  { %98 = shalt.err (!%p95_p9)
}
  0x15   :  { %29 = dma.hbm_to_vmem [thread:$0]  %s153_s1, 64, %s27_s12, [#allocation6]  }
  0x16   :  { %119 = dma.done.wait [#allocation3], 64  }
  0x17   :  { %120 = vsyncadd [#allocation3], 4294967232 }
  0x18   :  { %121 = dma.done.wait [#allocation6], 64  }
  0x19   :  { %122 = vsyncadd [#allocation6], 4294967232  ;;  %s127_s19 = smov [#allocation7]   ;;  %v36_v0 = vld [vmem:[#allocation2] sm:$0xf] }
  0x1a   :  { %s46_s20 = sshll.u32 %s127_s19, 4  ;;  %v37_v1 = vld [vmem:[#allocation5] sm:$0xf]  ;;  %s47_s20 = int_to_ptr.vmem [resolvable:$true] %s46_s20 }
  0x1b   :  { %v38_v2 = vmul.f32 %v37_v1, %v36_v0  ;;  %s99_s0 = scalar_lea.vmem %s47_s20, 64  ;;  %p104_p11 = scmp.lt.s32.totalorder %s47_s20, %s47_s20 }
  0x1c   :  { %p100_p10 = scmp.ne.s32.totalorder %s47_s20, %s99_s0  ;;  %p105_p12 = scmp.lt.s32.totalorder %s99_s0, %s99_s0 }
  0x1d   :  { %39 = vst [vmem:[#allocation7] sm:$0xf] %v38_v2 }
  0x1e   :  { %p106_p13 = por %p105_p12, %p104_p11 }
  0x20   :  { %p107_p0 = pnand %p106_p13, %p100_p10 }
  0x22   :  { %110 = shalt.err (!%p107_p0)
}
  0x23   :  { %49 = dma.vmem_to_hbm [thread:$0]  %s47_s20, 64, %s154_s2, [#allocation4]  }
  0x24   :  { %123 = dma.done.wait [#allocation4], 64  }
  0x25   :  { %124 = vsyncadd [#allocation4], 4294967232 }
  0x26   :  { %53 = vsyncpa [#allocation3], 1 }
  0x27   :  { %54 = vsyncpa [#allocation6], 1 }
  0x28   :  { %55 = vsyncpa [#allocation4], 1 }

</bundles_post_ra>
